<compile_context>
chip_gen: v7x
topology: tpu7x:2x2x1
jax: 0.10.0
libtpu: 0.0.40
codegen_flags: <defaults>
</compile_context>

<pallas_src>
import functools

import jax
import jax.numpy as jnp
from jax import lax
from jax.experimental import pallas as pl
from jax.experimental.pallas import tpu as pltpu

LANES = 128
SUBLANES = 8


def _cdiv(a, b):
    return -(-a // b)


def _round_up(a, b):
    return _cdiv(a, b) * b


def _num_tensorcores():
    """2 on v7x (dual TensorCore per chip), 1 on v5e/v6e (single TensorCore)."""
    try:
        kind = jax.devices()[0].device_kind.lower()
    except Exception:
        return 1
    if "v7" in kind or "7x" in kind:
        return 2
    return 1


def _masked_mse_kernel(inp_ref, tgt_ref, out_ref, *, ignore_index, rows,
                       tile_rows, blocks_per_core, has_tail):
    p = pl.program_id(0)
    k = pl.program_id(1)

    @pl.when(k == 0)
    def _():
        out_ref[...] = jnp.zeros_like(out_ref)

    def accumulate(apply_row_mask):
        # mask = target.ne(ignore_index); diff = (input - target) * mask.
        # Operands are cast to f32 before subtraction (exact for f32 inputs,
        # correct accumulation for bf16 inputs); NaN/Inf at masked positions
        # propagate exactly like PyTorch's input*mask - target*mask.
        tgt = tgt_ref[...]
        mask = (tgt != ignore_index).astype(jnp.float32)
        d = (inp_ref[...].astype(jnp.float32) - tgt.astype(jnp.float32)) * mask
        if apply_row_mask:
            base_row = (p * blocks_per_core + k) * tile_rows
            row_ids = lax.broadcasted_iota(jnp.int32, (tile_rows, 1), 0) + base_row
            d = jnp.where(row_ids < rows, d, 0.0)
        sq = d * d
        # Keep the accumulator vreg-shaped: sublane-aligned VPU adds only;
        # the tiny cross-lane/cross-sublane reduce happens once in the wrapper.
        partial = jnp.sum(sq.reshape(tile_rows // SUBLANES, SUBLANES, LANES),
                          axis=0)
        out_ref[...] += partial[None]

    if has_tail:
        # Only tail / clamped-duplicate blocks pay for the row mask; full
        # steady-state blocks run mask-free.
        base_row = (p * blocks_per_core + k) * tile_rows
        is_tail = base_row + tile_rows > rows

        @pl.when(jnp.logical_not(is_tail))
        def _():
            accumulate(False)

        @pl.when(is_tail)
        def _():
            accumulate(True)
    else:
        accumulate(False)


def masking_mse_loss(inp, tgt, ignore_index, *, tile_rows=4096):
    """Masked MSE loss (mean over all elements), computed in a Pallas TPU kernel."""
    assert inp.shape == tgt.shape
    total_n = inp.size
    ncores = _num_tensorcores()

    itemsize = jnp.dtype(inp.dtype).itemsize
    sub = max(SUBLANES, 32 // itemsize)  # min 2nd-minor tile: 8 f32, 16 bf16

    # Flatten to a lane-dense (rows, 128) slab.  Ragged total sizes are padded
    # with ignore_index targets (those elements are masked to 0 and the divisor
    # stays the true count); the common aligned case is a pure reshape.
    pad_to = LANES * sub
    rem = (-total_n) % pad_to
    if rem:
        inp_flat = jnp.pad(inp.reshape(-1), (0, rem))
        tgt_flat = jnp.pad(tgt.reshape(-1), (0, rem),
                           constant_values=ignore_index)
    else:
        inp_flat = inp.reshape(-1)
        tgt_flat = tgt.reshape(-1)
    rows = (total_n + rem) // LANES

    # Big blocks (4096x128xf32 = 2 MiB/input/step, 8 MiB double-buffered)
    # amortize per-grid-step overhead; never exceed the per-core row share.
    tile_rows = max(sub, (tile_rows // sub) * sub)
    tile_rows = min(tile_rows, _round_up(_cdiv(rows, ncores), sub))

    total_blocks = _cdiv(rows, tile_rows)
    blocks_per_core = _cdiv(total_blocks, ncores)
    has_tail = (ncores * blocks_per_core * tile_rows) != rows

    inp2 = inp_flat.reshape(rows, LANES)
    tgt2 = tgt_flat.reshape(rows, LANES)

    def in_index_map(p, k):
        # Clamp so a core whose (virtual) block range runs past the end never
        # issues an out-of-bounds DMA; its contribution is zeroed by the
        # in-kernel row mask (is_tail path).
        return (jnp.minimum(p * blocks_per_core + k, total_blocks - 1), 0)

    kernel = functools.partial(
        _masked_mse_kernel,
        ignore_index=ignore_index,
        rows=rows,
        tile_rows=tile_rows,
        blocks_per_core=blocks_per_core,
        has_tail=has_tail,
    )

    if ncores > 1:
        # True per-TensorCore sharding on v7x; "parallel" alone does not
        # change codegen on single-TC chips.
        sem0 = getattr(pltpu, "CORE_PARALLEL", "parallel")
    else:
        sem0 = "arbitrary"

    partials = pl.pallas_call(
        kernel,
        out_shape=jax.ShapeDtypeStruct((ncores, SUBLANES, LANES), jnp.float32),
        grid_spec=pltpu.PrefetchScalarGridSpec(
            num_scalar_prefetch=0,
            grid=(ncores, blocks_per_core),
            in_specs=[
                pl.BlockSpec((tile_rows, LANES), in_index_map),
                pl.BlockSpec((tile_rows, LANES), in_index_map),
            ],
            out_specs=pl.BlockSpec((1, SUBLANES, LANES), lambda p, k: (p, 0, 0)),
        ),
        compiler_params=pltpu.CompilerParams(
            dimension_semantics=(sem0, "arbitrary"),
            vmem_limit_bytes=32 * 1024 * 1024,
        ),
    )(inp2, tgt2)

    # TODO(synk): for latency-critical tiny inputs, move this final cross-lane
    # reduction + divide into a kernel epilogue (per-core scalar output).
    return jnp.sum(partials) / jnp.float32(total_n)


def reference_masking_mse_loss(inp, tgt, ignore_index):
    mask = (tgt != ignore_index).astype(tgt.dtype)
    i = inp * mask
    t = tgt * mask
    return jnp.mean((i - t) ** 2)


if __name__ == "__main__":
    key = jax.random.PRNGKey(0)
    k1, k2, k3 = jax.random.split(key, 3)

    # PyTorch-style NCHW inputs
    B, C, H, W = 2, 4, 16, 16
    ignore_index = -1.0

    inp = jax.random.normal(k1, (B, C, H, W), dtype=jnp.float32)
    tgt = jax.random.normal(k2, (B, C, H, W), dtype=jnp.float32)
    # sprinkle some ignore_index values into the target
    ignore_mask = jax.random.bernoulli(k3, p=0.25, shape=(B, C, H, W))
    tgt = jnp.where(ignore_mask, jnp.float32(ignore_index), tgt)

    loss = masking_mse_loss(inp, tgt, ignore_index)
    loss = jax.block_until_ready(loss)

    ref = reference_masking_mse_loss(inp, tgt, ignore_index)
    assert jnp.allclose(loss, ref, rtol=1e-5, atol=1e-6), (loss, ref)

    print("KERNEL_OK")
</pallas_src>

<mosaic_0001>
module attributes {stable_mosaic.version = 11 : i64} {
  func.func @_masked_mse_kernel(%arg0: i32, %arg1: i32, %arg2: memref<16x128xf32, #tpu.memory_space<vmem>>, %arg3: memref<16x128xf32, #tpu.memory_space<vmem>>, %arg4: memref<1x8x128xf32, #tpu.memory_space<vmem>>) attributes {dimension_semantics = [#tpu.dimension_semantics<arbitrary>, #tpu.dimension_semantics<arbitrary>], iteration_bounds = array<i64: 1, 1>, scalar_prefetch = 0 : i64, scratch_operands = 0 : i64, tpu.core_type = #tpu.core_type<tc>, window_params = [{transform_indices = @transform_0, window_bounds = array<i64: 16, 128>}, {transform_indices = @transform_1, window_bounds = array<i64: 16, 128>}, {transform_indices = @transform_2, window_bounds = array<i64: 1, 8, 128>}]} {
    %c0_i32 = arith.constant 0 : i32
    %0 = arith.cmpi eq, %arg1, %c0_i32 : i32
    %1 = arith.extui %0 : i1 to i32
    %c0_i32_0 = arith.constant 0 : i32
    %2 = arith.cmpi ne, %1, %c0_i32_0 : i32
    scf.if %2 {
      %cst_11 = arith.constant 0.000000e+00 : f32
      %18 = vector.broadcast %cst_11 : f32 to vector<1x8x128xf32>
      %c0_12 = arith.constant 0 : index
      %c0_13 = arith.constant 0 : index
      %c0_14 = arith.constant 0 : index
      %19 = vector.load %arg4[%c0_12, %c0_13, %c0_14] : memref<1x8x128xf32, #tpu.memory_space<vmem>>, vector<1x8x128xf32>
      tpu.vector_store %arg4[%c0_12, %c0_13, %c0_14], %18 {strides = array<i32>} : memref<1x8x128xf32, #tpu.memory_space<vmem>>, vector<1x8x128xf32>,
    } else {
    }
    %c0 = arith.constant 0 : index
    %c0_1 = arith.constant 0 : index
    %3 = vector.load %arg3[%c0, %c0_1] : memref<16x128xf32, #tpu.memory_space<vmem>>, vector<16x128xf32>
    %cst = arith.constant -1.000000e+00 : f32
    %4 = vector.broadcast %cst : f32 to vector<16x128xf32>
    %5 = arith.cmpf one, %3, %4 : vector<16x128xf32>
    %6 = arith.extui %5 : vector<16x128xi1> to vector<16x128xi32>
    %7 = arith.sitofp %6 : vector<16x128xi32> to vector<16x128xf32>
    %c0_2 = arith.constant 0 : index
    %c0_3 = arith.constant 0 : index
    %8 = vector.load %arg2[%c0_2, %c0_3] : memref<16x128xf32, #tpu.memory_space<vmem>>, vector<16x128xf32>
    %9 = arith.subf %8, %3 : vector<16x128xf32>
    %10 = arith.mulf %9, %7 : vector<16x128xf32>
    %11 = arith.mulf %10, %10 : vector<16x128xf32>
    %12 = vector.shape_cast %11 : vector<16x128xf32> to vector<2x8x128xf32>
    %cst_4 = arith.constant dense<0.000000e+00> : vector<8x128xf32>
    %13 = vector.multi_reduction <add>, %12, %cst_4 [0] : vector<2x8x128xf32> to vector<8x128xf32>
    %c0_5 = arith.constant 0 : index
    %c0_6 = arith.constant 0 : index
    %c0_7 = arith.constant 0 : index
    %14 = vector.load %arg4[%c0_5, %c0_6, %c0_7] : memref<1x8x128xf32, #tpu.memory_space<vmem>>, vector<1x8x128xf32>
    %15 = vector.shape_cast %13 : vector<8x128xf32> to vector<1x8x128xf32>
    %16 = arith.addf %14, %15 : vector<1x8x128xf32>
    %c0_8 = arith.constant 0 : index
    %c0_9 = arith.constant 0 : index
    %c0_10 = arith.constant 0 : index
    %17 = vector.load %arg4[%c0_8, %c0_9, %c0_10] : memref<1x8x128xf32, #tpu.memory_space<vmem>>, vector<1x8x128xf32>
    tpu.vector_store %arg4[%c0_8, %c0_9, %c0_10], %16 {strides = array<i32>} : memref<1x8x128xf32, #tpu.memory_space<vmem>>, vector<1x8x128xf32>,
    return
  }
  func.func @transform_0(%arg0: i32, %arg1: i32) -> (i32, i32) {
    %c1_i32 = arith.constant 1 : i32
    %0 = arith.muli %arg0, %c1_i32 : i32
    %1 = arith.addi %0, %arg1 : i32
    %c0_i32 = arith.constant 0 : i32
    %2 = arith.minsi %1, %c0_i32 : i32
    %c0_i32_0 = arith.constant 0 : i32
    %c0_i32_1 = arith.constant 0 : i32
    return %2, %c0_i32_0 : i32, i32
  }
  func.func @transform_1(%arg0: i32, %arg1: i32) -> (i32, i32) {
    %c1_i32 = arith.constant 1 : i32
    %0 = arith.muli %arg0, %c1_i32 : i32
    %1 = arith.addi %0, %arg1 : i32
    %c0_i32 = arith.constant 0 : i32
    %2 = arith.minsi %1, %c0_i32 : i32
    %c0_i32_0 = arith.constant 0 : i32
    %c0_i32_1 = arith.constant 0 : i32
    return %2, %c0_i32_0 : i32, i32
  }
  func.func @transform_2(%arg0: i32, %arg1: i32) -> (i32, i32, i32) {
    %c0_i32 = arith.constant 0 : i32
    %c0_i32_0 = arith.constant 0 : i32
    %c0_i32_1 = arith.constant 0 : i32
    return %arg0, %c0_i32, %c0_i32_0 : i32, i32, i32
  }
}

</mosaic_0001>

<bundles_post_ra>
// kernel: tpu_custom_call.1
= control target key start
LH: loop header
LB: loop body
LE: loop exit
PB: predicated region body
PF: predicated region fallthrough
CT: control target
= control target key end

     0   :  { %7 = vsyncpa [#allocation3], 0  ;;  %s242_s0 = inlined_call_operand.hbm [shape: f32[16,128], index: 0, kind: input, shape index: {}]   ;;  %s243_s1 = inlined_call_operand.hbm [shape: f32[16,128], index: 1, kind: input, shape index: {}]   ;;  %s244_s2 = inlined_call_operand.hbm [shape: f32[1,8,128], index: 2, kind: output, shape index: {}]  }
   0x1   :  { %8 = vsyncpa [#allocation6], 0 }
   0x2   :  { %9 = vsyncpa [#allocation4], 0  ;;  %s185_s9 = smov [#allocation2]   ;;  %s113_s13 = scalar_lea.hbm %s242_s0, 256 }
   0x3   :  { %s21_s10 = sshll.u32 %s185_s9, 4  ;;  %p114_p0 = scmp.ne.s32.totalorder %s242_s0, %s113_s13  ;;  %s22_s10 = int_to_ptr.vmem [resolvable:$true] %s21_s10 }
   0x4   :  { %p117_p1 = scmp.lt.u32.totalorder %s113_s13, %s242_s0 }
   0x6   :  { %p119_p2 = pnand %p117_p1, %p114_p0 }
   0x8   :  { %122 = shalt.err (!%p119_p2)
}
   0x9   :  { %s123_s18 = scalar_lea.vmem %s22_s10, 256  ;;  %p128_p4 = scmp.lt.s32.totalorder %s22_s10, %s22_s10 }
   0xa   :  { %p124_p3 = scmp.ne.s32.totalorder %s22_s10, %s123_s18  ;;  %p129_p5 = scmp.lt.s32.totalorder %s123_s18, %s123_s18 }
   0xc   :  { %p130_p6 = por %p129_p5, %p128_p4 }
   0xe   :  { %p131_p7 = pnand %p130_p6, %p124_p3 }
  0x10   :  { %134 = shalt.err (!%p131_p7)
}
  0x11   :  { %s186_s19 = smov 128   ;;  %s187_s20 = smov 8  }
  0x12   :  { %27 = dma.hbm_to_vmem [thread:$0]  %s242_s0, 256, %s22_s10, [#allocation3], %s186_s19, %s186_s19, %s187_s20  }
  0x13   :  { %s188_s23 = smov [#allocation5]   ;;  %s135_s27 = scalar_lea.hbm %s243_s1, 256 }
  0x14   :  { %s39_s24 = sshll.u32 %s188_s23, 4  ;;  %p136_p8 = scmp.ne.s32.totalorder %s243_s1, %s135_s27  ;;  %s40_s24 = int_to_ptr.vmem [resolvable:$true] %s39_s24 }
  0x15   :  { %p139_p9 = scmp.lt.u32.totalorder %s135_s27, %s243_s1 }
  0x17   :  { %p141_p10 = pnand %p139_p9, %p136_p8 }
  0x19   :  { %144 = shalt.err (!%p141_p10)
}
  0x1a   :  { %s145_s4 = scalar_lea.vmem %s40_s24, 256  ;;  %p150_p12 = scmp.lt.s32.totalorder %s40_s24, %s40_s24 }
  0x1b   :  { %p146_p11 = scmp.ne.s32.totalorder %s40_s24, %s145_s4  ;;  %p151_p13 = scmp.lt.s32.totalorder %s145_s4, %s145_s4 }
  0x1d   :  { %p152_p0 = por %p151_p13, %p150_p12 }
  0x1f   :  { %p153_p1 = pnand %p152_p0, %p146_p11 }
  0x21   :  { %156 = shalt.err (!%p153_p1)
}
  0x22   :  { %45 = dma.hbm_to_vmem [thread:$0]  %s243_s1, 256, %s40_s24, [#allocation6], %s186_s19, %s186_s19, %s187_s20  }
  0x23   :  { %179 = dma.done.wait [#allocation3], 256  }
  0x24   :  { %180 = vsyncadd [#allocation3], 4294967040 }
  0x25   :  { %181 = dma.done.wait [#allocation6], 256  }
  0x26   :  { %182 = vsyncadd [#allocation6], 4294967040  ;;  %v65_v0 = vld [vmem:[#allocation5] sm:$0xff]  ;;  %v66_v1 = vld [vmem:[#allocation5 + $0x8] sm:$0xff]  ;;  %v189_v5 = vmov 0.0   ;;  %s190_s1 = smov [#allocation7]  }
  0x27   :  { %v73_v2 = vld [vmem:[#allocation2] sm:$0xff]  ;;  %vm67_vm0 = vcmp.ne.f32.partialorder %v65_v0, -1.0  ;;  %vm68_vm1 = vcmp.ne.f32.partialorder %v66_v1, -1.0  ;;  %v74_v3 = vld [vmem:[#allocation2 + $0x8] sm:$0xff]  ;;  %s91_s6 = sshll.u32 %s190_s1, 4  ;;  %s92_s6 = int_to_ptr.vmem [resolvable:$true] %s91_s6 }
  0x28   :  { %v75_v4 = vsub.f32 %v73_v2, %v65_v0  ;;  %v105_v6 = vsel %vm67_vm0, 1.0, %v189_v5  ;;  %v106_v7 = vsel %vm68_vm1, 1.0, %v189_v5  ;;  %v76_v8 = vsub.f32 %v74_v3, %v66_v1  ;;  %s157_s7 = scalar_lea.vmem %s92_s6, 128  ;;  %p162_p3 = scmp.lt.s32.totalorder %s92_s6, %s92_s6 }
  0x29   :  { %p158_p2 = scmp.ne.s32.totalorder %s92_s6, %s157_s7  ;;  %p163_p4 = scmp.lt.s32.totalorder %s157_s7, %s157_s7 }
  0x2a   :  { %v77_v9 = vmul.f32 %v105_v6, %v75_v4  ;;  %v78_v10 = vmul.f32 %v106_v7, %v76_v8 }
  0x2b   :  { %p164_p5 = por %p163_p4, %p162_p3 }
  0x2c   :  { %v79_v11 = vmul.f32 %v77_v9, %v77_v9  ;;  %v80_v12 = vmul.f32 %v78_v10, %v78_v10 }
  0x2d   :  { %p165_p6 = pnand %p164_p5, %p158_p2 }
  0x2e   :  { %v81_v13 = vadd.f32 %v80_v12, %v79_v11 }
  0x30   :  { %84 = vst [vmem:[#allocation7] sm:$0xff] %v81_v13 }
  0x31   :  { %168 = shalt.err (!%p165_p6)
}
  0x32   :  { %s169_s10 = scalar_lea.hbm %s244_s2, 128 }
  0x33   :  { %p170_p7 = scmp.ne.s32.totalorder %s244_s2, %s169_s10  ;;  %p173_p8 = scmp.lt.u32.totalorder %s169_s10, %s244_s2 }
  0x35   :  { %p175_p9 = pnand %p173_p8, %p170_p7 }
  0x37   :  { %178 = shalt.err (!%p175_p9)
}
  0x38   :  { %94 = dma.vmem_to_hbm [thread:$0]  %s92_s6, 128, %s244_s2, [#allocation4]  }
  0x39   :  { %183 = dma.done.wait [#allocation4], 128  }
  0x3a   :  { %184 = vsyncadd [#allocation4], 4294967168 }
  0x3b   :  { %98 = vsyncpa [#allocation3], 1 }
  0x3c   :  { %99 = vsyncpa [#allocation6], 1 }
  0x3d   :  { %100 = vsyncpa [#allocation4], 1 }

</bundles_post_ra>
